<compile_context>
chip_gen: v7x
topology: tpu7x:2x2x1
jax: 0.10.0
libtpu: 0.0.40
codegen_flags: <defaults>
</compile_context>

<pallas_src>
import jax
import jax.numpy as jnp
from jax import lax
from jax.experimental import pallas as pl
from jax.experimental.pallas import tpu as pltpu


def _round_up(v, m):
    return (v + m - 1) // m * m


def e2e_kernel(x_ref, wc_ref, wrt_ref, bias_ref, e_ref, out_ref, rc_ref):
    """One grid step = one block of `bn` samples.

    x_ref   : (bn, C, D, D)  NCHW input block
    wc_ref  : (F, C*D)       col-conv weight, (c, i) flattened
    wrt_ref : (C, D, F)      row-conv weight, wrt[c, j, f] = Wr[f, c, 0, j]
    bias_ref: (F, 1)         br + bc
    e_ref   : (2*D, Dp2)     fused 0/1 expansion matrix [row-part ; col-part]
    out_ref : (bn, F, Dp2)   lane-dense output slab
    rc_ref  : (bn*F, 2*D)    f32 scratch holding [row + bias | col] per sample
    """
    bn, C, D, _ = x_ref.shape
    F = wc_ref.shape[0]

    wc = wc_ref[...]          # (F, C*D)
    wrt = wrt_ref[...]        # (C, D, F)
    bias = bias_ref[...]      # (F, 1)

    # Per-sample line convolutions (small MXU matmuls; x stays in its natural
    # orientation for both -> no per-channel transposes of x).
    for n in range(bn):
        x_n = x_ref[n]                                        # (C, D, D)

        # col[f, j] = sum_{c,i} wc[f, (c,i)] * x[c, i, j]
        col = jnp.dot(wc, x_n.reshape(C * D, D),
                      preferred_element_type=jnp.float32)     # (F, D)

        # row_t[i, f] = sum_{c,j} x[c, i, j] * wrt[c, j, f]
        row_t = lax.dot_general(
            x_n, wrt,
            dimension_numbers=(((2,), (1,)), ((0,), (0,))),
            preferred_element_type=jnp.float32).sum(axis=0)   # (D, F)
        row = row_t.T + bias                                  # (F, D)

        rc_ref[n * F:(n + 1) * F, :] = jnp.concatenate([row, col], axis=-1)

    # Single fused expansion matmul + single unmasked lane-dense store for the
    # whole block:  out[(n,f), i*D + j] = row[n,f,i] + bias[f] + col[n,f,j].
    out = jnp.dot(rc_ref[...], e_ref[...],
                  preferred_element_type=jnp.float32)         # (bn*F, Dp2)
    out_ref[...] = out.reshape(bn, F, e_ref.shape[1]).astype(out_ref.dtype)


def _num_parallel_cores():
    """TensorCores a single Pallas grid is sharded over (megacore)."""
    try:
        kind = jax.devices()[0].device_kind.lower()
    except Exception:
        return 1
    # v4 (megacore) and v7x expose 2 TensorCores per device; v2/v3/v5e/v6e: 1.
    if "v4" in kind or "v7" in kind or "7x" in kind:
        return 2
    return 1


def _block_vmem_bytes(bn, C, D, F, Dp2, out_itemsize):
    """Rough per-grid-step VMEM footprint (double-buffered blocks)."""
    x_blk = bn * C * _round_up(D, 8) * _round_up(D, 128) * 4
    o_blk = bn * _round_up(F, 8) * Dp2 * out_itemsize
    rc = _round_up(bn * F, 8) * _round_up(2 * D, 128) * 4
    consts = (_round_up(F, 8) * _round_up(C * D, 128) * 4        # wc_flat
              + C * _round_up(D, 8) * _round_up(F, 128) * 4      # wrt
              + _round_up(F, 8) * 128 * 4                        # bias
              + _round_up(2 * D, 8) * Dp2 * 4)                   # e_all
    return 2 * (x_blk + o_blk + consts) + rc


def _pick_block_n(N, C, D, F, Dp2, out_itemsize, vmem_budget):
    n_cores = _num_parallel_cores()
    best = 1
    for bn in range(1, min(N, 8) + 1):   # cap 8: static sample loop in kernel
        if N % bn != 0:
            continue
        if N >= n_cores and (N // bn) < n_cores:
            continue                      # keep every TensorCore busy
        if _block_vmem_bytes(bn, C, D, F, Dp2, out_itemsize) > vmem_budget:
            continue
        best = bn
    return best


def edge2edge(x, wr, br, wc, bc, *, block_n=None, out_dtype=None):
    """x: (N, C, D, D) NCHW; wr: (F, C, 1, D); wc: (F, C, D, 1)."""
    N, C, D, _ = x.shape
    F = wr.shape[0]
    out_dtype = x.dtype if out_dtype is None else jnp.dtype(out_dtype)
    out_itemsize = jnp.dtype(out_dtype).itemsize

    DD = D * D
    Dp2 = _round_up(DD, 128)              # lane-dense, unmasked output stores

    if block_n is None:
        block_n = _pick_block_n(N, C, D, F, Dp2, out_itemsize,
                                vmem_budget=16 * 1024 * 1024)
    assert N % block_n == 0
    grid = (N // block_n,)

    # ---- tiny weight / constant plumbing (plain JAX, done once) ----
    wc_flat = wc[:, :, :, 0].reshape(F, C * D)              # (F, (c, i))
    wrt = jnp.transpose(wr[:, :, 0, :], (1, 2, 0))          # (C, D_j, F)
    bias = (br + bc).reshape(F, 1).astype(jnp.float32)

    # Fused 0/1 expansion matrix:
    #   E[i,   k] = 1 iff k // D == i   (row part, i < D)
    #   E[D+j, k] = 1 iff k %  D == j   (col part)
    k = jnp.arange(Dp2)
    r = jnp.arange(D)
    valid = (k < DD)[None, :]
    e_row = ((k[None, :] // D) == r[:, None]) & valid
    e_col = ((k[None, :] % D) == r[:, None]) & valid
    e_all = jnp.concatenate([e_row, e_col], axis=0).astype(jnp.float32)  # (2D, Dp2)

    flops = 4 * N * F * C * DD + 2 * N * F * (2 * D) * Dp2
    bytes_accessed = (x.size * x.dtype.itemsize
                      + (wc_flat.size + wrt.size + bias.size + e_all.size) * 4
                      + N * F * Dp2 * out_itemsize)
    cost = pl.CostEstimate(flops=int(flops), transcendentals=0,
                           bytes_accessed=int(bytes_accessed))

    out_flat = pl.pallas_call(
        e2e_kernel,
        out_shape=jax.ShapeDtypeStruct((N, F, Dp2), out_dtype),
        grid_spec=pltpu.PrefetchScalarGridSpec(
            num_scalar_prefetch=0,
            grid=grid,
            in_specs=[
                pl.BlockSpec((block_n, C, D, D), lambda b: (b, 0, 0, 0)),
                pl.BlockSpec((F, C * D), lambda b: (0, 0)),
                pl.BlockSpec((C, D, F), lambda b: (0, 0, 0)),
                pl.BlockSpec((F, 1), lambda b: (0, 0)),
                pl.BlockSpec((2 * D, Dp2), lambda b: (0, 0)),
            ],
            out_specs=pl.BlockSpec((block_n, F, Dp2), lambda b: (b, 0, 0)),
            scratch_shapes=[pltpu.VMEM((block_n * F, 2 * D), jnp.float32)],
        ),
        compiler_params=pltpu.CompilerParams(
            dimension_semantics=("parallel",),
            vmem_limit_bytes=32 * 1024 * 1024),
        cost_estimate=cost,
    )(x, wc_flat, wrt, bias, e_all)

    # Drop lane padding (no-op for D=16) and reshape back to PyTorch layout.
    return out_flat[:, :, :DD].reshape(N, F, D, D)


def reference(x, wr, br, wc, bc):
    """Pure-JAX reference of the PyTorch forward."""
    row = jnp.einsum("ncij,fcj->nfi", x, wr[:, :, 0, :]) + br[None, :, None]
    col = jnp.einsum("ncij,fci->nfj", x, wc[:, :, :, 0]) + bc[None, :, None]
    return row[:, :, :, None] + col[:, :, None, :]


if __name__ == "__main__":
    N, C, D, F = 2, 4, 16, 8  # batch, channel, dim (ROI), filters

    key = jax.random.PRNGKey(0)
    kx, kwr, kbr, kwc, kbc = jax.random.split(key, 5)

    x = jax.random.normal(kx, (N, C, D, D), dtype=jnp.float32)
    # Conv2d(channel, filters, (1, dim)) weight/bias
    wr = jax.random.normal(kwr, (F, C, 1, D), dtype=jnp.float32) * 0.1
    br = jax.random.normal(kbr, (F,), dtype=jnp.float32) * 0.1
    # Conv2d(channel, filters, (dim, 1)) weight/bias
    wc = jax.random.normal(kwc, (F, C, D, 1), dtype=jnp.float32) * 0.1
    bc = jax.random.normal(kbc, (F,), dtype=jnp.float32) * 0.1

    out = jax.block_until_ready(edge2edge(x, wr, br, wc, bc))
    ref = jax.block_until_ready(reference(x, wr, br, wc, bc))

    assert out.shape == (N, F, D, D), out.shape
    assert jnp.allclose(out, ref, atol=1e-4, rtol=1e-4), float(jnp.max(jnp.abs(out - ref)))
    print("KERNEL_OK")
</pallas_src>

<mosaic_0001>
module attributes {stable_mosaic.version = 11 : i64} {
  func.func @e2e_kernel(%arg0: i32, %arg1: memref<2x4x16x16xf32, #tpu.memory_space<vmem>>, %arg2: memref<8x64xf32, #tpu.memory_space<vmem>>, %arg3: memref<4x16x8xf32, #tpu.memory_space<vmem>>, %arg4: memref<8x1xf32, #tpu.memory_space<vmem>>, %arg5: memref<32x256xf32, #tpu.memory_space<vmem>>, %arg6: memref<2x8x256xf32, #tpu.memory_space<vmem>>, %arg7: memref<16x32xf32, #tpu.memory_space<vmem>>) attributes {dimension_semantics = [#tpu.dimension_semantics<parallel>], iteration_bounds = array<i64: 1>, scalar_prefetch = 0 : i64, scratch_operands = 1 : i64, tpu.core_type = #tpu.core_type<tc>, window_params = [{transform_indices = @transform_0, window_bounds = array<i64: 2, 4, 16, 16>}, {pipeline_mode = #tpu.pipeline_mode<synchronous>, transform_indices = @transform_1, window_bounds = array<i64: 8, 64>}, {pipeline_mode = #tpu.pipeline_mode<synchronous>, transform_indices = @transform_2, window_bounds = array<i64: 4, 16, 8>}, {pipeline_mode = #tpu.pipeline_mode<synchronous>, transform_indices = @transform_3, window_bounds = array<i64: 8, 1>}, {pipeline_mode = #tpu.pipeline_mode<synchronous>, transform_indices = @transform_4, window_bounds = array<i64: 32, 256>}, {transform_indices = @transform_5, window_bounds = array<i64: 2, 8, 256>}]} {
    %c0 = arith.constant 0 : index
    %c0_0 = arith.constant 0 : index
    %0 = vector.load %arg2[%c0, %c0_0] : memref<8x64xf32, #tpu.memory_space<vmem>>, vector<8x64xf32>
    %c0_1 = arith.constant 0 : index
    %c0_2 = arith.constant 0 : index
    %c0_3 = arith.constant 0 : index
    %1 = vector.load %arg3[%c0_1, %c0_2, %c0_3] : memref<4x16x8xf32, #tpu.memory_space<vmem>>, vector<4x16x8xf32>
    %c0_4 = arith.constant 0 : index
    %c0_5 = arith.constant 0 : index
    %2 = vector.load %arg4[%c0_4, %c0_5] : memref<8x1xf32, #tpu.memory_space<vmem>>, vector<8x1xf32>
    %c0_6 = arith.constant 0 : index
    %c0_7 = arith.constant 0 : index
    %c0_8 = arith.constant 0 : index
    %c0_9 = arith.constant 0 : index
    %3 = vector.load %arg1[%c0_6, %c0_7, %c0_8, %c0_9] : memref<2x4x16x16xf32, #tpu.memory_space<vmem>>, vector<1x4x16x16xf32>
    %4 = vector.shape_cast %3 : vector<1x4x16x16xf32> to vector<4x16x16xf32>
    %5 = vector.shape_cast %4 : vector<4x16x16xf32> to vector<64x16xf32>
    %cst = arith.constant dense<0.000000e+00> : vector<8x16xf32>
    %6 = tpu.matmul %0, %5, %cst {dimension_numbers = #tpu.dot_dimension_numbers<[1], [0], [0], [1], [0, 0, 1, 1], [], []>} : vector<8x64xf32>, vector<64x16xf32>, vector<8x16xf32> -> vector<8x16xf32>
    %cst_10 = arith.constant dense<0.000000e+00> : vector<4x16x8xf32>
    %7 = tpu.matmul %4, %1, %cst_10 {dimension_numbers = #tpu.dot_dimension_numbers<[2], [1], [1], [2], [0, 0, 0, 1, 1, 2], [0], [0]>} : vector<4x16x16xf32>, vector<4x16x8xf32>, vector<4x16x8xf32> -> vector<4x16x8xf32>
    %cst_11 = arith.constant dense<0.000000e+00> : vector<16x8xf32>
    %8 = vector.multi_reduction <add>, %7, %cst_11 [0] : vector<4x16x8xf32> to vector<16x8xf32>
    %9 = tpu.transpose %8, [1, 0] : vector<16x8xf32> -> vector<8x16xf32>
    %10 = vector.broadcast %2 : vector<8x1xf32> to vector<8x16xf32>
    %11 = arith.addf %9, %10 : vector<8x16xf32>
    %12 = tpu.concatenate %11, %6 in 1 : vector<8x16xf32>, vector<8x16xf32> -> vector<8x32xf32>
    %c0_12 = arith.constant 0 : index
    %c0_13 = arith.constant 0 : index
    %13 = vector.load %arg7[%c0_12, %c0_13] : memref<16x32xf32, #tpu.memory_space<vmem>>, vector<8x32xf32>
    tpu.vector_store %arg7[%c0_12, %c0_13], %12 {strides = array<i32>} : memref<16x32xf32, #tpu.memory_space<vmem>>, vector<8x32xf32>,
    %c1 = arith.constant 1 : index
    %c0_14 = arith.constant 0 : index
    %c0_15 = arith.constant 0 : index
    %c0_16 = arith.constant 0 : index
    %14 = vector.load %arg1[%c1, %c0_14, %c0_15, %c0_16] : memref<2x4x16x16xf32, #tpu.memory_space<vmem>>, vector<1x4x16x16xf32>
    %15 = vector.shape_cast %14 : vector<1x4x16x16xf32> to vector<4x16x16xf32>
    %16 = vector.shape_cast %15 : vector<4x16x16xf32> to vector<64x16xf32>
    %cst_17 = arith.constant dense<0.000000e+00> : vector<8x16xf32>
    %17 = tpu.matmul %0, %16, %cst_17 {dimension_numbers = #tpu.dot_dimension_numbers<[1], [0], [0], [1], [0, 0, 1, 1], [], []>} : vector<8x64xf32>, vector<64x16xf32>, vector<8x16xf32> -> vector<8x16xf32>
    %cst_18 = arith.constant dense<0.000000e+00> : vector<4x16x8xf32>
    %18 = tpu.matmul %15, %1, %cst_18 {dimension_numbers = #tpu.dot_dimension_numbers<[2], [1], [1], [2], [0, 0, 0, 1, 1, 2], [0], [0]>} : vector<4x16x16xf32>, vector<4x16x8xf32>, vector<4x16x8xf32> -> vector<4x16x8xf32>
    %cst_19 = arith.constant dense<0.000000e+00> : vector<16x8xf32>
    %19 = vector.multi_reduction <add>, %18, %cst_19 [0] : vector<4x16x8xf32> to vector<16x8xf32>
    %20 = tpu.transpose %19, [1, 0] : vector<16x8xf32> -> vector<8x16xf32>
    %21 = vector.broadcast %2 : vector<8x1xf32> to vector<8x16xf32>
    %22 = arith.addf %20, %21 : vector<8x16xf32>
    %23 = tpu.concatenate %22, %17 in 1 : vector<8x16xf32>, vector<8x16xf32> -> vector<8x32xf32>
    %c8 = arith.constant 8 : index
    %c0_20 = arith.constant 0 : index
    %24 = vector.load %arg7[%c8, %c0_20] : memref<16x32xf32, #tpu.memory_space<vmem>>, vector<8x32xf32>
    tpu.vector_store %arg7[%c8, %c0_20], %23 {strides = array<i32>} : memref<16x32xf32, #tpu.memory_space<vmem>>, vector<8x32xf32>,
    %c0_21 = arith.constant 0 : index
    %c0_22 = arith.constant 0 : index
    %25 = vector.load %arg7[%c0_21, %c0_22] : memref<16x32xf32, #tpu.memory_space<vmem>>, vector<16x32xf32>
    %c0_23 = arith.constant 0 : index
    %c0_24 = arith.constant 0 : index
    %26 = vector.load %arg5[%c0_23, %c0_24] : memref<32x256xf32, #tpu.memory_space<vmem>>, vector<32x256xf32>
    %cst_25 = arith.constant dense<0.000000e+00> : vector<16x256xf32>
    %27 = tpu.matmul %25, %26, %cst_25 {dimension_numbers = #tpu.dot_dimension_numbers<[1], [0], [0], [1], [0, 0, 1, 1], [], []>} : vector<16x32xf32>, vector<32x256xf32>, vector<16x256xf32> -> vector<16x256xf32>
    %28 = vector.shape_cast %27 : vector<16x256xf32> to vector<2x8x256xf32>
    %c0_26 = arith.constant 0 : index
    %c0_27 = arith.constant 0 : index
    %c0_28 = arith.constant 0 : index
    %29 = vector.load %arg6[%c0_26, %c0_27, %c0_28] : memref<2x8x256xf32, #tpu.memory_space<vmem>>, vector<2x8x256xf32>
    tpu.vector_store %arg6[%c0_26, %c0_27, %c0_28], %28 {strides = array<i32>} : memref<2x8x256xf32, #tpu.memory_space<vmem>>, vector<2x8x256xf32>,
    return
  }
  func.func @transform_0(%arg0: i32) -> (i32, i32, i32, i32) {
    %c0_i32 = arith.constant 0 : i32
    %c0_i32_0 = arith.constant 0 : i32
    %c0_i32_1 = arith.constant 0 : i32
    %c0_i32_2 = arith.constant 0 : i32
    return %arg0, %c0_i32, %c0_i32_0, %c0_i32_1 : i32, i32, i32, i32
  }
  func.func @transform_1(%arg0: i32) -> (i32, i32) {
    %c0_i32 = arith.constant 0 : i32
    %c0_i32_0 = arith.constant 0 : i32
    %c0_i32_1 = arith.constant 0 : i32
    return %c0_i32, %c0_i32_0 : i32, i32
  }
  func.func @transform_2(%arg0: i32) -> (i32, i32, i32) {
    %c0_i32 = arith.constant 0 : i32
    %c0_i32_0 = arith.constant 0 : i32
    %c0_i32_1 = arith.constant 0 : i32
    %c0_i32_2 = arith.constant 0 : i32
    return %c0_i32, %c0_i32_0, %c0_i32_1 : i32, i32, i32
  }
  func.func @transform_3(%arg0: i32) -> (i32, i32) {
    %c0_i32 = arith.constant 0 : i32
    %c0_i32_0 = arith.constant 0 : i32
    %c0_i32_1 = arith.constant 0 : i32
    return %c0_i32, %c0_i32_0 : i32, i32
  }
  func.func @transform_4(%arg0: i32) -> (i32, i32) {
    %c0_i32 = arith.constant 0 : i32
    %c0_i32_0 = arith.constant 0 : i32
    %c0_i32_1 = arith.constant 0 : i32
    return %c0_i32, %c0_i32_0 : i32, i32
  }
  func.func @transform_5(%arg0: i32) -> (i32, i32, i32) {
    %c0_i32 = arith.constant 0 : i32
    %c0_i32_0 = arith.constant 0 : i32
    %c0_i32_1 = arith.constant 0 : i32
    return %arg0, %c0_i32, %c0_i32_0 : i32, i32, i32
  }
}

</mosaic_0001>

<bundles_post_ra>
// kernel: tpu_custom_call.1
= control target key start
LH: loop header
LB: loop body
LE: loop exit
PB: predicated region body
PF: predicated region fallthrough
CT: control target
= control target key end

     0   :  { %10 = vsyncpa [#allocation4], 0  ;;  %s1544_s0 = inlined_call_operand.hbm [shape: f32[2,4,16,16], index: 0, kind: input, shape index: {}]   ;;  %s1545_s1 = inlined_call_operand.vmem [shape: f32[8,64], index: 1, kind: input, shape index: {}]   ;;  %s1546_s2 = inlined_call_operand.vmem [shape: f32[4,16,8], index: 2, kind: input, shape index: {}]   ;;  %s1547_s3 = inlined_call_operand.vmem [shape: f32[8,1], index: 3, kind: input, shape index: {}]   ;;  %s1548_s4 = inlined_call_operand.vmem [shape: f32[32,256], index: 4, kind: input, shape index: {}]   ;;  %s1549_s5 = inlined_call_operand.hbm [shape: f32[2,8,256], index: 5, kind: output, shape index: {}]  }
   0x1   :  { %11 = vsyncpa [#allocation5], 0  ;;  %s1373_s18 = smov [#allocation3]   ;;  %s1325_s22 = scalar_lea.hbm %s1544_s0, 2048 }
   0x2   :  { %s17_s19 = sshll.u32 %s1373_s18, 4  ;;  %p1326_p0 = scmp.ne.s32.totalorder %s1544_s0, %s1325_s22  ;;  %s18_s19 = int_to_ptr.vmem [resolvable:$true] %s17_s19 }
   0x3   :  { %p1329_p1 = scmp.lt.u32.totalorder %s1325_s22, %s1544_s0 }
   0x5   :  { %p1331_p2 = pnand %p1329_p1, %p1326_p0 }
   0x7   :  { %1334 = shalt.err (!%p1331_p2)
}
   0x8   :  { %s1335_s27 = scalar_lea.vmem %s18_s19, 2048  ;;  %p1340_p4 = scmp.lt.s32.totalorder %s18_s19, %s18_s19 }
   0x9   :  { %p1336_p3 = scmp.ne.s32.totalorder %s18_s19, %s1335_s27  ;;  %p1341_p5 = scmp.lt.s32.totalorder %s1335_s27, %s1335_s27 }
   0xb   :  { %p1342_p6 = por %p1341_p5, %p1340_p4 }
   0xd   :  { %p1343_p7 = pnand %p1342_p6, %p1336_p3 }
   0xf   :  { %1346 = shalt.err (!%p1343_p7)
}
  0x10   :  { %s1374_s28 = smov 128   ;;  %s1375_s29 = smov 8  }
  0x11   :  { %23 = dma.hbm_to_vmem [thread:$0]  %s1544_s0, 2048, %s18_s19, [#allocation4], %s1374_s28, %s1374_s28, %s1375_s29  }
  0x12   :  { %1369 = dma.done.wait [#allocation4], 2048  }
  0x13   :  { %1370 = vsyncadd [#allocation4], 4294965248  ;;  %v1376_v0 = vmov 0.0|0.0   ;;  %vm1377_vm0 = vmmov 0   ;;  %v1378_v1 = vmov 0.0   ;;  %v1379_v2 = vmov 0  }
  0x14   :  { %1246 = vmatprep.subr.bf16.mxu0 %v1376_v0  ;;  %1168 = vmatprep.mubr.msk.f32.mxu0 %vm1377_vm0, %v1378_v1  ;;  %vm127_vm1 = vcmask 130048   ;;  %v45_v3 = vld [vmem:[#allocation3] sm:$0xff]  ;;  %v46_v4 = vld [vmem:[#allocation3 + $0x8] sm:$0xff]  ;;  %v47_v5 = vld [vmem:[#allocation3 + $0x10] sm:$0xff]  ;;  %vm53_vm2 = vcmask 523264   ;;  %vm452_vm3 = vcmask 64512  }
  0x15   :  { %1324 = vset.pattern.permute.xlu0 %v1379_v2  ;;  %v1247_v6 = vpack.c.bf16 %v46_v4, %v45_v3  ;;  %v48_v7 = vld [vmem:[#allocation3 + $0x18] sm:$0xff]  ;;  %1175 = vmatprep.mubr.msk.f32.mxu1 %vm127_vm1, %v45_v3  ;;  %v36_v8 = vld [vmem:[%s1546_s2] sm:$0xff]  ;;  %v38_v12 = vld [vmem:[%s1546_s2 + $0x10] sm:$0xff]  ;;  %vm510_vm4 = vcmask 261120  }
  0x16   :  { %v37_v9 = vld [vmem:[%s1546_s2 + $0x8] sm:$0xff]  ;;  %v1250_v10 = vpack.c.bf16 %v48_v7, %v47_v5  ;;  %v39_v13 = vld [vmem:[%s1546_s2 + $0x18] sm:$0xff]  ;;  %v49_v14 = vld [vmem:[#allocation3 + $0x20] sm:$0xff] }
  0x17   :  { %1248 = vmatpush3.bf16.msra.mxu0 %v1247_v6  ;;  %v1258_v11 = vpack.c.bf16 %v37_v9, %v36_v8  ;;  %v50_v15 = vld [vmem:[#allocation3 + $0x28] sm:$0xff]  ;;  %v1262_v16 = vpack.c.bf16 %v39_v13, %v38_v12  ;;  %v40_v17 = vld [vmem:[%s1546_s2 + $0x20] sm:$0xff]  ;;  %v41_v18 = vld [vmem:[%s1546_s2 + $0x28] sm:$0xff] }
  0x18   :  { %1249 = vmatprep.subr.bf16.mxu0 %v1376_v0  ;;  %v1253_v19 = vpack.c.bf16 %v50_v15, %v49_v14  ;;  %v51_v20 = vld [vmem:[#allocation3 + $0x30] sm:$0xff]  ;;  %v52_v21 = vld [vmem:[#allocation3 + $0x38] sm:$0xff]  ;;  %v1266_v22 = vpack.c.bf16 %v41_v18, %v40_v17  ;;  %v42_v23 = vld [vmem:[%s1546_s2 + $0x30] sm:$0xff] }
  0x19   :  { %1259 = vmatprep.subr.bf16.mxu1 %v1258_v11  ;;  %v43_v24 = vld [vmem:[%s1546_s2 + $0x38] sm:$0xff]  ;;  %v44_v25 = vld [vmem:[%s1547_s3] sm:$0xff]  ;;  %v1256_v26 = vpack.c.bf16 %v52_v21, %v51_v20  ;;  %v513_v28 = vld [vmem:[#allocation3 + $0x40] sm:$0xff] }
  0x1a   :  { %1261 = vmatpush3.bf16.msra.mxu1 %v1258_v11  ;;  %501 = vperm.xlu0 %1324, %v44_v25   ;;  %v1270_v27 = vpack.c.bf16 %v43_v24, %v42_v23  ;;  %v514_v29 = vld [vmem:[#allocation3 + $0x48] sm:$0xff]  ;;  %v35_v30 = vld [vmem:[%s1545_s1] sm:$0xff]  ;;  %v516_v33 = vld [vmem:[#allocation3 + $0x58] sm:$0xff]  ;;  %s1380_s1 = smov 16  }
  0x1b   :  { %1251 = vmatpush3.bf16.msra.mxu0 %v1250_v10  ;;  %1263 = vmatprep.subr.bf16.mxu1 %v1262_v16  ;;  %v1275_v31 = vpack.c.bf16 %v514_v29, %v513_v28  ;;  %v515_v32 = vld [vmem:[#allocation3 + $0x50] sm:$0xff]  ;;  %v517_v35 = vld [vmem:[#allocation3 + $0x60] sm:$0xff]  ;;  %v518_v36 = vld [vmem:[#allocation3 + $0x68] sm:$0xff] }
  0x1c   :  { %1252 = vmatprep.subr.bf16.mxu0 %v1376_v0  ;;  %v1278_v34 = vpack.c.bf16 %v516_v33, %v515_v32  ;;  %v1281_v37 = vpack.c.bf16 %v518_v36, %v517_v35  ;;  %v519_v38 = vld [vmem:[#allocation3 + $0x70] sm:$0xff]  ;;  %v520_v39 = vld [vmem:[#allocation3 + $0x78] sm:$0xff] }
  0x1d   :  { %1176 = vmatmul.mubr.msk.f32.vlgmr.msra.gmra.mrb[0].mxu1 %vm127_vm1, %v46_v4  ;;  %v1284_v40 = vpack.c.bf16 %v520_v39, %v519_v38  ;;  %v971_v25 = vld [vmem:[%s1548_s4 + $0x8] sm:$0xff] }
  0x1e   :  { %1265 = vmatpush3.bf16.msra.mxu1 %v1262_v16  ;;  %1182 = vmatprep.mubr.msk.f32.mxu1 %vm127_vm1, %v47_v5 }
  0x1f   :  { %1254 = vmatpush3.bf16.msra.mxu0 %v1253_v19  ;;  %1267 = vmatprep.subr.bf16.mxu1 %v1266_v22 }
  0x20   :  { %1255 = vmatprep.subr.bf16.mxu0 %v1376_v0 }
  0x21   :  { %1183 = vmatmul.mubr.msk.f32.vlgmr.msra.gmra.mrb[2].mxu1 %vm127_vm1, %v48_v7 }
  0x22   :  { %1269 = vmatpush3.bf16.msra.mxu1 %v1266_v22  ;;  %1189 = vmatprep.mubr.msk.f32.mxu1 %vm127_vm1, %v49_v14 }
  0x23   :  { %1257 = vmatpush3.bf16.msra.mxu0 %v1256_v26  ;;  %1271 = vmatprep.subr.bf16.mxu1 %v1270_v27  ;;  %v973_v26 = vld [vmem:[%s1548_s4 + $0x18] sm:$0xff] }
  0x24   :  { %1274 = vmatprep.subr.bf16.mxu0 %v1376_v0 }
  0x25   :  { %1190 = vmatmul.mubr.msk.f32.vlgmr.msra.gmra.mrb[4].mxu1 %vm127_vm1, %v50_v15 }
  0x26   :  { %1169 = vmatmul.mubr.msk.f32.vlgmr.msra.gmra.mrb[0].mxu0 %vm53_vm2, %v35_v30  ;;  %1273 = vmatpush3.bf16.msra.mxu1 %v1270_v27 }
  0x27   :  { %1276 = vmatpush3.bf16.msra.mxu0 %v1275_v31  ;;  %1196 = vmatprep.mubr.msk.f32.mxu1 %vm127_vm1, %v51_v20  ;;  %v975_v31 = vld [vmem:[%s1548_s4 + $0x28] sm:$0xff] }
  0x28   :  { %1277 = vmatprep.subr.bf16.mxu0 %v1376_v0  ;;  %1287 = vmatprep.subr.bf16.mxu1 %v1258_v11 }
  0x29   :  { %1197 = vmatmul.mubr.msk.f32.vlgmr.msra.gmra.mrb[6].mxu1 %vm127_vm1, %v52_v21  ;;  %1215 = vmatprep.mubr.msk.f32.mxu0 %vm1377_vm0, %v1378_v1 }
  0x2a   :  { %1289 = vmatpush3.bf16.msra.mxu1 %v1258_v11  ;;  %1222 = vmatprep.mubr.msk.f32.mxu1 %vm127_vm1, %v513_v28  ;;  %v970_v28 = vld [vmem:[%s1548_s4] sm:$0xff] }
  0x2b   :  { %1279 = vmatpush3.bf16.msra.mxu0 %v1278_v34  ;;  %1291 = vmatprep.subr.bf16.mxu1 %v1262_v16 }
  0x2c   :  { %1280 = vmatprep.subr.bf16.mxu0 %v1376_v0 }
  0x2d   :  { %1223 = vmatmul.mubr.msk.f32.vlgmr.msra.gmra.mrb[8].mxu1 %vm127_vm1, %v514_v29  ;;  %v972_v29 = vld [vmem:[%s1548_s4 + $0x10] sm:$0xff] }
  0x2e   :  { %1293 = vmatpush3.bf16.msra.mxu1 %v1262_v16  ;;  %1229 = vmatprep.mubr.msk.f32.mxu1 %vm127_vm1, %v515_v32  ;;  %v977_v32 = vld [vmem:[%s1548_s4 + $0x38] sm:$0xff] }
  0x2f   :  { %1282 = vmatpush3.bf16.msra.mxu0 %v1281_v37  ;;  %1295 = vmatprep.subr.bf16.mxu1 %v1266_v22  ;;  %v1306_v34 = vpack.c.bf16 %v977_v32, %v975_v31 }
  0x30   :  { %1283 = vmatprep.subr.bf16.mxu0 %v1376_v0 }
  0x31   :  { %1230 = vmatmul.mubr.msk.f32.vlgmr.msra.gmra.mrb[10].mxu1 %vm127_vm1, %v516_v33  ;;  %v974_v33 = vld [vmem:[%s1548_s4 + $0x20] sm:$0xff] }
  0x32   :  { %1297 = vmatpush3.bf16.msra.mxu1 %v1266_v22  ;;  %1236 = vmatprep.mubr.msk.f32.mxu1 %vm127_vm1, %v517_v35  ;;  %v976_v35 = vld [vmem:[%s1548_s4 + $0x30] sm:$0xff]  ;;  %s1381_s4 = smov [#allocation6]  }
  0x33   :  { %1285 = vmatpush3.bf16.msra.mxu0 %v1284_v40  ;;  %1299 = vmatprep.subr.bf16.mxu1 %v1270_v27  ;;  %s1070_s14 = sshll.u32 %s1381_s4, 4  ;;  %s1071_s14 = int_to_ptr.vmem [resolvable:$true] %s1070_s14 }
  0x34   :  { %s1347_s15 = scalar_lea.vmem %s1071_s14, 512  ;;  %p1352_p9 = scmp.lt.s32.totalorder %s1071_s14, %s1071_s14 }
  0x35   :  { %1237 = vmatmul.mubr.msk.f32.vlgmr.msra.gmra.mrb[12].mxu1 %vm127_vm1, %v518_v36  ;;  %v1308_v36 = vpack.c.bf16 %v976_v35, %v974_v33  ;;  %p1348_p8 = scmp.ne.s32.totalorder %s1071_s14, %s1347_s15  ;;  %p1353_p10 = scmp.lt.s32.totalorder %s1347_s15, %s1347_s15 }
  0x36   :  { %1216 = vmatmul.mubr.msk.f32.vlgmr.msra.gmra.mrb[2].mxu0 %vm53_vm2, %v35_v30  ;;  %1301 = vmatpush3.bf16.msra.mxu1 %v1270_v27  ;;  %v1302_v27 = vpack.c.bf16 %v973_v26, %v971_v25  ;;  %v1304_v30 = vpack.c.bf16 %v972_v29, %v970_v28 }
  0x37   :  { %1243 = vmatprep.mubr.msk.f32.mxu1 %vm127_vm1, %v519_v38  ;;  %1048 = vmatprep.mubr.f32.mxu0 %v1378_v1  ;;  %p1354_p11 = por %p1353_p10, %p1352_p9 }
  0x38   :  { %1310 = vmatprep.subr.bf16.mxu1 %v1302_v27  ;;  %1303 = vmatprep.subr.bf16.mxu0 %v1302_v27 }
  0x39   :  { %1244 = vmatmul.mubr.msk.f32.vlgmr.msra.gmra.mrb[14].mxu1 %vm127_vm1, %v520_v39  ;;  %1305 = vmatpush1.bf16.msra.mxu0 %v1304_v30  ;;  %p1355_p12 = pnand %p1354_p11, %p1348_p8 }
  0x3a   :  { %1054 = vmatprep.mubr.f32.mxu1 %v1378_v1  ;;  %1312 = vmatpush1.bf16.msra.mxu1 %v1304_v30 }
  0x3b   :  { %1311 = vmatprep.subr.bf16.mxu1 %v1306_v34  ;;  %1307 = vmatprep.subr.bf16.mxu0 %v1306_v34 }
  0x3d   :  { %1309 = vmatpush1.bf16.msra.mxu0 %v1308_v36 }
  0x3e   :  { %1313 = vmatpush1.bf16.msra.mxu1 %v1308_v36 }
  0x99   :  { %v502_v37 = vpop.permute.xlu0 %501 }
  0xf0   :  { %v1177_v41 = vpop.f32.mrb[0].mxu1 }
  0xf1   :  { %v200_v42 = vpop.f32.mrb[1].mxu1  ;;  %v460_v43 = vsel %vm452_vm3, %v1177_v41, 0.0 }
  0xf2   :  { %v453_v44 = vsel %vm452_vm3, %v200_v42, 0.0 }
  0xf4   :  { %v1184_v45 = vpop.f32.mrb[2].mxu1 }
  0xf5   :  { %v461_v46 = vsel %vm452_vm3, %v1184_v45, 0.0  ;;  %v281_v47 = vpop.f32.mrb[3].mxu1 }
  0xf6   :  { %v462_v48 = vadd.f32 %v461_v46, %v460_v43  ;;  %v454_v49 = vsel %vm452_vm3, %v281_v47, 0.0 }
  0xf7   :  { %v455_v50 = vadd.f32 %v454_v49, %v453_v44 }
  0xf8   :  { %v1191_v51 = vpop.f32.mrb[4].mxu1 }
  0xf9   :  { %v123_v52 = vpop.f32.mrb[0].mxu0  ;;  %v463_v53 = vsel %vm452_vm3, %v1191_v51, 0.0  ;;  %v362_v54 = vpop.f32.mrb[5].mxu1 }
  0xfa   :  { %506 = vrot.lane.b32.xlu0 %v123_v52, %s1380_s1  ;;  %v1170_v55 = vpop.f32.mrb[1].mxu0  ;;  %v464_v56 = vadd.f32 %v463_v53, %v462_v48  ;;  %v456_v57 = vsel %vm452_vm3, %v362_v54, 0.0 }
  0xfb   :  { %v457_v58 = vadd.f32 %v456_v57, %v455_v50 }
  0xfc   :  { %v1198_v59 = vpop.f32.mrb[6].mxu1 }
  0xfd   :  { %v465_v60 = vsel %vm452_vm3, %v1198_v59, 0.0  ;;  %v443_v61 = vpop.f32.mrb[7].mxu1 }
  0xfe   :  { %v466_v62 = vadd.f32 %v465_v60, %v464_v56  ;;  %v458_v63 = vsel %vm452_vm3, %v443_v61, 0.0 }
  0xff   :  { %v459_v0 = vadd.f32 %v458_v63, %v457_v58 }
 0x100   :  { %v1224_v1 = vpop.f32.mrb[8].mxu1 }
 0x101   :  { %v663_v2 = vpop.f32.mrb[9].mxu1  ;;  %v922_v3 = vsel %vm452_vm3, %v1224_v1, 0.0 }
 0x102   :  { %v915_v4 = vsel %vm452_vm3, %v663_v2, 0.0 }
 0x104   :  { %v1231_v5 = vpop.f32.mrb[10].mxu1 }
 0x105   :  { %v923_v6 = vsel %vm452_vm3, %v1231_v5, 0.0  ;;  %v744_v7 = vpop.f32.mrb[11].mxu1 }
 0x106   :  { %v924_v8 = vadd.f32 %v923_v6, %v922_v3  ;;  %v916_v9 = vsel %vm452_vm3, %v744_v7, 0.0 }
 0x107   :  { %v917_v10 = vadd.f32 %v916_v9, %v915_v4 }
 0x108   :  { %v1238_v11 = vpop.f32.mrb[12].mxu1 }
 0x109   :  { %v587_v12 = vpop.f32.mrb[2].mxu0  ;;  %v925_v13 = vsel %vm452_vm3, %v1238_v11, 0.0  ;;  %v825_v14 = vpop.f32.mrb[13].mxu1 }
 0x10a   :  { %963 = vrot.lane.b32.xlu1 %v587_v12, %s1380_s1  ;;  %v1217_v15 = vpop.f32.mrb[3].mxu0  ;;  %v926_v16 = vadd.f32 %v925_v13, %v924_v8  ;;  %v918_v17 = vsel %vm452_vm3, %v825_v14, 0.0 }
 0x10b   :  { %v919_v18 = vadd.f32 %v918_v17, %v917_v10 }
 0x10c   :  { %v1245_v19 = vpop.f32.mrb[14].mxu1 }
 0x10d   :  { %v927_v20 = vsel %vm452_vm3, %v1245_v19, 0.0  ;;  %v906_v21 = vpop.f32.mrb[15].mxu1 }
 0x10e   :  { %v928_v22 = vadd.f32 %v927_v20, %v926_v16  ;;  %v920_v23 = vsel %vm452_vm3, %v906_v21, 0.0 }
 0x10f   :  { %v921_v24 = vadd.f32 %v920_v23, %v919_v18 }
 0x118   :  { %929 = vxpose.xlu0.b32.start [1/2] (short) (narrow) %v921_v24, 8 }
 0x11c   :  { %930 = vxpose.xlu0.b32.end [2/2] (short) (narrow) %v928_v22, 8 }
 0x133   :  { %467 = vxpose.xlu1.b32.start [1/2] (short) (narrow) %v459_v0, 8 }
 0x137   :  { %468 = vxpose.xlu1.b32.end [2/2] (short) (narrow) %v466_v62, 8 }
 0x16c   :  { %v507_v38 = vpop.permute.xlu0 %506 }
 0x17c   :  { %v964_v41 = vpop.permute.xlu1 %963 }
 0x198   :  { %v945_v39 = vpop.trf.xlu0 }
 0x199   :  { %v961_v40 = vadd.f32 %v945_v39, %v502_v37 }
 0x19b   :  { %v966_v42 = vsel %vm127_vm1, %v961_v40, %v964_v41 }
 0x19c   :  { %967 = vst.msk [vmem:[#allocation2 + $0x8] sm:$0xff] %vm510_vm4, %v966_v42 }
 0x1a3   :  { %v969_v43 = vld [vmem:[#allocation2 + $0x8] sm:$0xff] }
 0x1a4   :  { %1101 = vmatmul.mubr.msk.f32.vlgmr.msra.gmra.mrb[16].mxu1 %vm510_vm4, %v969_v43 }
 0x1b3   :  { %v483_v44 = vpop.trf.xlu1 }
 0x1b4   :  { %v504_v45 = vadd.f32 %v502_v37, %v483_v44 }
 0x1b6   :  { %v509_v46 = vsel %vm127_vm1, %v504_v45, %v507_v38 }
 0x1b7   :  { %511 = vst.msk [vmem:[#allocation2] sm:$0xff] %vm510_vm4, %v509_v46 }
 0x1be   :  { %v968_v47 = vld [vmem:[#allocation2] sm:$0xff] }
 0x1bf   :  { %1100 = vmatmul.mubr.msk.f32.vlgmr.msra.gmra.mrb[4].mxu0 %vm510_vm4, %v968_v47 }
 0x277   :  { %v1056_v48 = vpop.f32.mrb[16].mxu1 }
 0x278   :  { %1063 = vst [vmem:[#allocation6 + $0x10] sm:$0xff] %v1056_v48  ;;  %v1058_v49 = vpop.f32.mrb[17].mxu1 }
 0x279   :  { %1064 = vst [vmem:[#allocation6 + $0x18] sm:$0xff] %v1058_v49 }
 0x292   :  { %v1050_v50 = vpop.f32.mrb[4].mxu0 }
 0x293   :  { %1061 = vst [vmem:[#allocation6] sm:$0xff] %v1050_v50  ;;  %v1052_v51 = vpop.f32.mrb[5].mxu0 }
 0x294   :  { %1062 = vst [vmem:[#allocation6 + $0x8] sm:$0xff] %v1052_v51 }
 0x295   :  { %1358 = shalt.err (!%p1355_p12)
}
 0x296   :  { %s1359_s18 = scalar_lea.hbm %s1549_s5, 512 }
 0x297   :  { %p1360_p13 = scmp.ne.s32.totalorder %s1549_s5, %s1359_s18  ;;  %p1363_p0 = scmp.lt.u32.totalorder %s1359_s18, %s1549_s5 }
 0x299   :  { %p1365_p1 = pnand %p1363_p0, %p1360_p13 }
 0x29b   :  { %1368 = shalt.err (!%p1365_p1)
}
 0x29c   :  { %s1382_s23 = smov 256  }
 0x29d   :  { %1076 = dma.vmem_to_hbm [thread:$0]  %s1071_s14, 512, %s1549_s5, [#allocation5], %s1382_s23, %s1382_s23, %s1380_s1  }
 0x29e   :  { %1371 = dma.done.wait [#allocation5], 512  }
 0x29f   :  { %1372 = vsyncadd [#allocation5], 4294966784 }
 0x2a0   :  { %1080 = vsyncpa [#allocation4], 1 }
 0x2a1   :  { %1081 = vsyncpa [#allocation5], 1 }

</bundles_post_ra>
